<compile_context>
chip_gen: v6e
topology: v6e:2x2x1
jax: 0.10.0
libtpu: 0.0.40
codegen_flags: <defaults>
</compile_context>

<pallas_src>
import functools

import jax
import jax.numpy as jnp
from jax import lax
from jax.experimental import pallas as pl
from jax.experimental.pallas import tpu as pltpu


def _round_up(x, m):
    return (x + m - 1) // m * m


# --------------------------------------------------------------------------
# Kernel
# --------------------------------------------------------------------------
def _prenorm_linear_kernel(x_ref, w_ref, bias_ref, o_ref, xn_ref, *, d_real, eps):
    # x_ref:   (tm, Dp)  token tile (lanes >= d_real are zero padding)
    # w_ref:   (Dp, tn)  bf16 weights with LN gamma folded in (rows >= d_real zero)
    # bias_ref:(1, tn)   f32 folded bias (= beta @ W + b)
    # o_ref:   (tm, tn)
    # xn_ref:  (tm, Dp)  bf16 scratch holding the normalized token tile,
    #                    computed once per token tile (j == 0) and reused for
    #                    every column slab j (column axis is "arbitrary").
    @pl.when(pl.program_id(1) == 0)
    def _():
        x = x_ref[...].astype(jnp.float32)
        inv_d = 1.0 / d_real
        mean = jnp.sum(x, axis=-1, keepdims=True) * inv_d
        # Padded lanes are zero, so raw moments need no padding correction.
        sumsq = jnp.sum(x * x, axis=-1, keepdims=True)
        var = sumsq * inv_d - mean * mean
        inv_std = lax.rsqrt(var + eps)
        # Padded lanes hold junk ((0 - mean) * inv_std) but hit zero rows of W.
        xn_ref[...] = ((x - mean) * inv_std).astype(xn_ref.dtype)

    out = jnp.dot(xn_ref[...], w_ref[...], preferred_element_type=jnp.float32)
    out = out + bias_ref[...]
    o_ref[...] = out.astype(o_ref.dtype)


# --------------------------------------------------------------------------
# Parameter preparation (can be hoisted / cached by callers reusing weights)
# --------------------------------------------------------------------------
def fold_prenorm_params(gamma, beta, w, bias, d_pad):
    """Fold the LayerNorm affine into the Linear and pad to lane-dense shapes.

    (xn * gamma + beta) @ W + b  ==  xn @ (gamma[:, None] * W) + (beta @ W + b)
    """
    d = w.shape[0]
    w_f = (gamma[:, None].astype(jnp.float32) * w.astype(jnp.float32))
    bias_f = (beta.astype(jnp.float32) @ w.astype(jnp.float32)
              + bias.astype(jnp.float32))
    pad = d_pad - d
    if pad:
        w_f = jnp.pad(w_f, ((0, pad), (0, pad)))
        bias_f = jnp.pad(bias_f, (0, pad))
    return w_f.astype(jnp.bfloat16), bias_f.reshape(1, d_pad)


# --------------------------------------------------------------------------
# Tile / VMEM budgeting
# --------------------------------------------------------------------------
def _vmem_budget():
    try:
        info = pltpu.get_tpu_info()
        cap = int(getattr(info, "vmem_capacity_bytes", 64 << 20))
    except Exception:  # pragma: no cover - conservative fallback (v7x = 64 MiB)
        cap = 64 << 20
    return cap


def _select_tiles(M, Dp, x_itemsize, out_itemsize, budget):
    """Pick (tm, tn) so the double-buffered working set fits `budget` bytes."""
    m8 = _round_up(M, 8)

    def working_set(tm_, tn_):
        x_buf = 2 * tm_ * Dp * x_itemsize      # double-buffered x tile
        w_buf = 2 * Dp * tn_ * 2               # bf16 W slab (conservative 2 bufs)
        o_buf = 2 * tm_ * tn_ * out_itemsize   # double-buffered output tile
        xn_sc = tm_ * Dp * 2                   # bf16 normalized-x scratch
        tmp = 2 * tm_ * Dp * 4                 # f32 LayerNorm temporaries
        return x_buf + w_buf + o_buf + xn_sc + tmp

    cands, seen = [], set()
    for c in (1024, 768, 512, 384, 256, 192, 128, 64, 32, 16, 8):
        c = min(c, m8)
        if c not in seen:
            seen.add(c)
            cands.append(c)

    # 1) Prefer W fully VMEM-resident (single column tile -> W DMA'd once).
    for tm_ in cands:
        if tm_ >= min(m8, 128) and working_set(tm_, Dp) <= budget:
            return tm_, Dp, working_set(tm_, Dp)

    # 2) Stream W in column slabs; 512/256 are 2x256-MXU friendly, 128 always
    #    divides Dp so this cannot fail.
    for tn_ in (512, 256, 128):
        if tn_ <= Dp and Dp % tn_ == 0:
            for tm_ in cands:
                if working_set(tm_, tn_) <= budget:
                    return tm_, tn_, working_set(tm_, tn_)

    return 8, 128, working_set(8, 128)


# --------------------------------------------------------------------------
# Public wrapper
# --------------------------------------------------------------------------
def prenorm_linear(x, gamma, beta, w, bias, *, eps=1e-5):
    """PreNorm(dim, Linear(dim, dim)): Linear(LayerNorm(x)).

    x: (B, N, D); gamma/beta/bias: (D,); w: (D, D) laid out as (D_in, D_out).
    """
    B, N, D = x.shape
    M = B * N
    Dp = _round_up(D, 128)

    vmem_cap = _vmem_budget()
    budget = int(vmem_cap * 0.75)  # headroom for compiler-internal scratch
    tm, tn, wset = _select_tiles(M, Dp, x.dtype.itemsize, x.dtype.itemsize, budget)
    Mp = _round_up(M, tm)

    # ---- fold LN affine into the Linear; pad + bf16-cast (cacheable) --------
    w_p, bias_p = fold_prenorm_params(gamma, beta, w, bias, Dp)

    # ---- x to a lane-dense 2-D slab (skip the copy when already aligned) ----
    x2d = x.reshape(M, D)
    if Mp != M or Dp != D:
        x2d = jnp.pad(x2d, ((0, Mp - M), (0, Dp - D)))

    n_i, n_j = Mp // tm, Dp // tn
    grid = (n_i, n_j)  # i = token tiles (parallel), j = column slabs (arbitrary)

    kernel = functools.partial(_prenorm_linear_kernel, d_real=float(D), eps=eps)

    w_reads = n_i if n_j > 1 else 1  # W streamed per token tile, or resident once
    cost = pl.CostEstimate(
        flops=2 * Mp * Dp * Dp,
        transcendentals=Mp,
        bytes_accessed=(Mp * Dp * x.dtype.itemsize          # x read
                        + w_reads * Dp * Dp * 2              # bf16 W slabs
                        + Dp * 4                             # folded bias
                        + Mp * Dp * x.dtype.itemsize),       # output write
    )

    vmem_limit = int(min(max(2 * wset, 32 << 20), int(vmem_cap * 0.9)))

    out = pl.pallas_call(
        kernel,
        out_shape=jax.ShapeDtypeStruct((Mp, Dp), x.dtype),
        grid_spec=pltpu.PrefetchScalarGridSpec(
            num_scalar_prefetch=0,
            grid=grid,
            in_specs=[
                # x tile: constant across j -> not re-DMA'd during the j sweep.
                pl.BlockSpec((tm, Dp), lambda i, j: (i, 0)),
                # W slab: (0, j); when tn == Dp the index is constant -> one DMA.
                pl.BlockSpec((Dp, tn), lambda i, j: (0, j)),
                pl.BlockSpec((1, tn), lambda i, j: (0, j)),
            ],
            out_specs=pl.BlockSpec((tm, tn), lambda i, j: (i, j)),
            scratch_shapes=[pltpu.VMEM((tm, Dp), jnp.bfloat16)],  # cached xn
        ),
        compiler_params=pltpu.CompilerParams(
            # j must be "arbitrary": the xn scratch is reused across the j sweep.
            dimension_semantics=("parallel", "arbitrary"),
            vmem_limit_bytes=vmem_limit,
        ),
        cost_estimate=cost,
    )(x2d, w_p, bias_p)

    if Mp != M or Dp != D:
        out = out[:M, :D]
    return out.reshape(B, N, D)


# --------------------------------------------------------------------------
# Self-test
# --------------------------------------------------------------------------
if __name__ == "__main__":
    B, N, D = 2, 8, 32

    key = jax.random.PRNGKey(0)
    kx, kg, kb, kw, kbias = jax.random.split(key, 5)

    x = jax.random.normal(kx, (B, N, D), dtype=jnp.float32)

    gamma = jnp.ones((D,), dtype=jnp.float32) + 0.1 * jax.random.normal(kg, (D,))
    beta = 0.1 * jax.random.normal(kb, (D,), dtype=jnp.float32)
    w = jax.random.normal(kw, (D, D), dtype=jnp.float32) / jnp.sqrt(D)  # (D_in, D_out)
    bias = 0.1 * jax.random.normal(kbias, (D,), dtype=jnp.float32)

    out = prenorm_linear(x, gamma, beta, w, bias)
    out = jax.block_until_ready(out)

    # Pure-f32 JAX reference (kernel uses bf16 MXU inputs -> slightly looser tol).
    mean = jnp.mean(x, axis=-1, keepdims=True)
    var = jnp.mean((x - mean) ** 2, axis=-1, keepdims=True)
    y = ((x - mean) / jnp.sqrt(var + 1e-5)) * gamma + beta
    ref = y @ w + bias
    assert jnp.allclose(out, ref, atol=2e-2, rtol=2e-2), "mismatch vs reference"

    print("KERNEL_OK")
</pallas_src>

<mosaic_0001>
module attributes {stable_mosaic.version = 11 : i64} {
  func.func @_prenorm_linear_kernel(%arg0: i32, %arg1: i32, %arg2: memref<16x128xf32, #tpu.memory_space<vmem>>, %arg3: memref<128x128xbf16, #tpu.memory_space<vmem>>, %arg4: memref<1x128xf32, #tpu.memory_space<vmem>>, %arg5: memref<16x128xf32, #tpu.memory_space<vmem>>, %arg6: memref<16x128xbf16, #tpu.memory_space<vmem>>) attributes {dimension_semantics = [#tpu.dimension_semantics<parallel>, #tpu.dimension_semantics<arbitrary>], iteration_bounds = array<i64: 1, 1>, scalar_prefetch = 0 : i64, scratch_operands = 1 : i64, tpu.core_type = #tpu.core_type<tc>, window_params = [{transform_indices = @transform_0, window_bounds = array<i64: 16, 128>}, {transform_indices = @transform_1, window_bounds = array<i64: 128, 128>}, {transform_indices = @transform_2, window_bounds = array<i64: 1, 128>}, {transform_indices = @transform_3, window_bounds = array<i64: 16, 128>}]} {
    %c0_i32 = arith.constant 0 : i32
    %0 = arith.cmpi eq, %arg1, %c0_i32 : i32
    %1 = arith.extui %0 : i1 to i32
    %c0_i32_0 = arith.constant 0 : i32
    %2 = arith.cmpi ne, %1, %c0_i32_0 : i32
    scf.if %2 {
      %c0_8 = arith.constant 0 : index
      %c0_9 = arith.constant 0 : index
      %10 = vector.load %arg2[%c0_8, %c0_9] : memref<16x128xf32, #tpu.memory_space<vmem>>, vector<16x128xf32>
      %cst_10 = arith.constant dense<0.000000e+00> : vector<16xf32>
      %11 = vector.multi_reduction <add>, %10, %cst_10 [1] : vector<16x128xf32> to vector<16xf32>
      %12 = vector.shape_cast %11 : vector<16xf32> to vector<16x1xf32>
      %cst_11 = arith.constant 3.125000e-02 : f32
      %13 = vector.broadcast %cst_11 : f32 to vector<16x1xf32>
      %14 = arith.mulf %12, %13 : vector<16x1xf32>
      %15 = arith.mulf %10, %10 : vector<16x128xf32>
      %cst_12 = arith.constant dense<0.000000e+00> : vector<16xf32>
      %16 = vector.multi_reduction <add>, %15, %cst_12 [1] : vector<16x128xf32> to vector<16xf32>
      %17 = vector.shape_cast %16 : vector<16xf32> to vector<16x1xf32>
      %cst_13 = arith.constant 3.125000e-02 : f32
      %18 = vector.broadcast %cst_13 : f32 to vector<16x1xf32>
      %19 = arith.mulf %17, %18 : vector<16x1xf32>
      %20 = arith.mulf %14, %14 : vector<16x1xf32>
      %21 = arith.subf %19, %20 : vector<16x1xf32>
      %cst_14 = arith.constant 9.99999974E-6 : f32
      %22 = vector.broadcast %cst_14 : f32 to vector<16x1xf32>
      %23 = arith.addf %21, %22 : vector<16x1xf32>
      %24 = math.rsqrt %23 : vector<16x1xf32>
      %25 = vector.broadcast %14 : vector<16x1xf32> to vector<16x128xf32>
      %26 = arith.subf %10, %25 : vector<16x128xf32>
      %27 = vector.broadcast %24 : vector<16x1xf32> to vector<16x128xf32>
      %28 = arith.mulf %26, %27 : vector<16x128xf32>
      %29 = arith.truncf %28 : vector<16x128xf32> to vector<16x128xbf16>
      %c0_15 = arith.constant 0 : index
      %c0_16 = arith.constant 0 : index
      %30 = vector.load %arg6[%c0_15, %c0_16] : memref<16x128xbf16, #tpu.memory_space<vmem>>, vector<16x128xbf16>
      tpu.vector_store %arg6[%c0_15, %c0_16], %29 {strides = array<i32>} : memref<16x128xbf16, #tpu.memory_space<vmem>>, vector<16x128xbf16>,
    } else {
    }
    %c0 = arith.constant 0 : index
    %c0_1 = arith.constant 0 : index
    %3 = vector.load %arg6[%c0, %c0_1] : memref<16x128xbf16, #tpu.memory_space<vmem>>, vector<16x128xbf16>
    %c0_2 = arith.constant 0 : index
    %c0_3 = arith.constant 0 : index
    %4 = vector.load %arg3[%c0_2, %c0_3] : memref<128x128xbf16, #tpu.memory_space<vmem>>, vector<128x128xbf16>
    %cst = arith.constant dense<0.000000e+00> : vector<16x128xf32>
    %5 = tpu.matmul %3, %4, %cst {dimension_numbers = #tpu.dot_dimension_numbers<[1], [0], [0], [1], [0, 0, 1, 1], [], []>} : vector<16x128xbf16>, vector<128x128xbf16>, vector<16x128xf32> -> vector<16x128xf32>
    %c0_4 = arith.constant 0 : index
    %c0_5 = arith.constant 0 : index
    %6 = vector.load %arg4[%c0_4, %c0_5] : memref<1x128xf32, #tpu.memory_space<vmem>>, vector<1x128xf32>
    %7 = vector.broadcast %6 : vector<1x128xf32> to vector<16x128xf32>
    %8 = arith.addf %5, %7 : vector<16x128xf32>
    %c0_6 = arith.constant 0 : index
    %c0_7 = arith.constant 0 : index
    %9 = vector.load %arg5[%c0_6, %c0_7] : memref<16x128xf32, #tpu.memory_space<vmem>>, vector<16x128xf32>
    tpu.vector_store %arg5[%c0_6, %c0_7], %8 {strides = array<i32>} : memref<16x128xf32, #tpu.memory_space<vmem>>, vector<16x128xf32>,
    return
  }
  func.func @transform_0(%arg0: i32, %arg1: i32) -> (i32, i32) {
    %c0_i32 = arith.constant 0 : i32
    %c0_i32_0 = arith.constant 0 : i32
    return %arg0, %c0_i32 : i32, i32
  }
  func.func @transform_1(%arg0: i32, %arg1: i32) -> (i32, i32) {
    %c0_i32 = arith.constant 0 : i32
    %c0_i32_0 = arith.constant 0 : i32
    return %c0_i32, %arg1 : i32, i32
  }
  func.func @transform_2(%arg0: i32, %arg1: i32) -> (i32, i32) {
    %c0_i32 = arith.constant 0 : i32
    %c0_i32_0 = arith.constant 0 : i32
    return %c0_i32, %arg1 : i32, i32
  }
  func.func @transform_3(%arg0: i32, %arg1: i32) -> (i32, i32) {
    %c0_i32 = arith.constant 0 : i32
    return %arg0, %arg1 : i32, i32
  }
}

</mosaic_0001>

<bundles_post_ra>
// kernel: tpu_custom_call.1
= control target key start
LH: loop header
LB: loop body
LE: loop exit
PB: predicated region body
PF: predicated region fallthrough
CT: control target
= control target key end

     0   :  { %8 = vsyncpa [#allocation4], 0  ;;  %s409_s0 = inlined_call_operand.hbm [shape: f32[16,128], index: 0, kind: input, shape index: {}]   ;;  %s410_s1 = inlined_call_operand.hbm [shape: bf16[128,128], index: 1, kind: input, shape index: {}]   ;;  %s411_s2 = inlined_call_operand.vmem [shape: f32[1,128], index: 2, kind: input, shape index: {}]   ;;  %s412_s3 = inlined_call_operand.hbm [shape: f32[16,128], index: 3, kind: output, shape index: {}]  }
   0x1   :  { %9 = vsyncpa [#allocation7], 0 }
   0x2   :  { %10 = vsyncpa [#allocation5], 0  ;;  %s362_s12 = smov [#allocation3]  }
   0x3   :  { %s16_s13 = sshll.u32 %s362_s12, 4  ;;  %s17_s13 = int_to_ptr.vmem [resolvable:$true] %s16_s13 }
   0x4   :  { %s304_s14 = scalar_lea.vmem %s17_s13, 256  ;;  %p309_p1 = scmp.lt.s32.totalorder %s17_s13, %s17_s13 }
   0x5   :  { %p305_p0 = scmp.ne.s32.totalorder %s17_s13, %s304_s14  ;;  %p310_p2 = scmp.lt.s32.totalorder %s304_s14, %s304_s14 }
   0x7   :  { %p311_p3 = por %p310_p2, %p309_p1 }
   0x9   :  { %p312_p4 = pnand %p311_p3, %p305_p0 }
   0xb   :  { %315 = shalt.err (!%p312_p4)
}
   0xc   :  { %s363_s15 = smov 128   ;;  %s364_s16 = smov 8  }
   0xd   :  { %22 = dma.hbm_to_vmem [thread:$0]  %s409_s0, 256, %s17_s13, [#allocation4], %s363_s15, %s363_s15, %s364_s16  }
   0xe   :  { %s365_s19 = smov [#allocation6]  }
   0xf   :  { %s28_s20 = sshll.u32 %s365_s19, 4  ;;  %s29_s20 = int_to_ptr.vmem [resolvable:$true] %s28_s20 }
  0x10   :  { %s324_s21 = scalar_lea.vmem %s29_s20, 1024  ;;  %p329_p6 = scmp.lt.s32.totalorder %s29_s20, %s29_s20 }
  0x11   :  { %p325_p5 = scmp.ne.s32.totalorder %s29_s20, %s324_s21  ;;  %p330_p7 = scmp.lt.s32.totalorder %s324_s21, %s324_s21 }
  0x13   :  { %p331_p8 = por %p330_p7, %p329_p6 }
  0x15   :  { %p332_p9 = pnand %p331_p8, %p325_p5 }
  0x17   :  { %335 = shalt.err (!%p332_p9)
}
  0x18   :  { %s366_s22 = smov 64   ;;  %s367_s23 = smov 4  }
  0x19   :  { %34 = dma.hbm_to_vmem [thread:$0]  %s410_s1, 1024, %s29_s20, [#allocation7], %s366_s22, %s366_s22, %s367_s23  }
  0x1a   :  { %356 = dma.done.wait [#allocation4], 256  }
  0x1b   :  { %357 = vsyncadd [#allocation4], 4294967040 }
  0x1c   :  { %358 = dma.done.wait [#allocation7], 1024  }
  0x1d   :  { %359 = vsyncadd [#allocation7], 4294966272  ;;  %v48_v0 = vld [vmem:[#allocation3] sm:$0xff]  ;;  %v49_v1 = vld [vmem:[#allocation3 + $0x8] sm:$0xff]  ;;  %v368_v5 = vmov 0.0   ;;  %vm369_vm0 = vmmov 0  }
  0x1e   :  { %50 = vadd.xlane.f32.xlu0 %v48_v0  ;;  %v56_v2 = vmul.f32 %v48_v0, %v48_v0  ;;  %v57_v3 = vmul.f32 %v49_v1, %v49_v1  ;;  %v283_v4 = vld [vmem:[#allocation6 + $0x38] sm:$0xff]   ;;  %254 = vmatprep.subr.bf16.mxu0 %v368_v5  ;;  %v284_v6 = vld [vmem:[#allocation6 + $0x30] sm:$0xff]   ;;  %v285_v7 = vld [vmem:[#allocation6 + $0x28] sm:$0xff]   ;;  %s370_s26 = smov [#allocation8]  }
  0x1f   :  { %255 = vmatpush3.bf16.msra.mxu0 %v283_v4  ;;  %v286_v8 = vld [vmem:[#allocation6 + $0x20] sm:$0xff]   ;;  %v287_v9 = vld [vmem:[#allocation6 + $0x18] sm:$0xff]   ;;  %v288_v10 = vld [vmem:[#allocation6 + $0x10] sm:$0xff]   ;;  %270 = vmatprep.mubr.msk.bf16.mxu0 %vm369_vm0, %v368_v5  ;;  %s213_s27 = sshll.u32 %s370_s26, 4  ;;  %s214_s27 = int_to_ptr.vmem [resolvable:$true] %s213_s27 }
  0x20   :  { %58 = vadd.xlane.f32.xlu1 %v56_v2  ;;  %256 = vmatprep.subr.bf16.mxu0 %v368_v5  ;;  %v289_v11 = vld [vmem:[#allocation6 + $0x8] sm:$0xff]   ;;  %v290_v12 = vld [vmem:[#allocation6] sm:$0xff]   ;;  %s336_s28 = scalar_lea.vmem %s214_s27, 256  ;;  %p341_p11 = scmp.lt.s32.totalorder %s214_s27, %s214_s27 }
  0x21   :  { %v228_v35 = vld [vmem:[%s411_s2] ss:$0 sm:$0xff]  ;;  %p337_p10 = scmp.ne.s32.totalorder %s214_s27, %s336_s28  ;;  %p342_p12 = scmp.lt.s32.totalorder %s336_s28, %s336_s28 }
  0x22   :  { %52 = vadd.xlane.f32.xlu0 %v49_v1 }
  0x23   :  { %257 = vmatpush3.bf16.msra.mxu0 %v284_v6  ;;  %p343_p13 = por %p342_p12, %p341_p11 }
  0x24   :  { %60 = vadd.xlane.f32.xlu1 %v57_v3  ;;  %258 = vmatprep.subr.bf16.mxu0 %v368_v5 }
  0x25   :  { %p344_p0 = pnand %p343_p13, %p337_p10 }
  0x27   :  { %259 = vmatpush3.bf16.msra.mxu0 %v285_v7 }
  0x28   :  { %260 = vmatprep.subr.bf16.mxu0 %v368_v5 }
  0x2b   :  { %261 = vmatpush3.bf16.msra.mxu0 %v286_v8 }
  0x2c   :  { %262 = vmatprep.subr.bf16.mxu0 %v368_v5 }
  0x2f   :  { %263 = vmatpush3.bf16.msra.mxu0 %v287_v9 }
  0x30   :  { %264 = vmatprep.subr.bf16.mxu0 %v368_v5 }
  0x33   :  { %265 = vmatpush3.bf16.msra.mxu0 %v288_v10 }
  0x34   :  { %266 = vmatprep.subr.bf16.mxu0 %v368_v5 }
  0x37   :  { %267 = vmatpush3.bf16.msra.mxu0 %v289_v11 }
  0x38   :  { %268 = vmatprep.subr.bf16.mxu0 %v368_v5 }
  0x3b   :  { %269 = vmatpush3.bf16.msra.mxu0 %v290_v12 }
  0xa7   :  { %v51_v13 = vpop.xlane.xlu0 %50 }
  0xa8   :  { %v54_v14 = vmul.f32 0.03125, %v51_v13 }
  0xa9   :  { %v59_v15 = vpop.xlane.xlu1 %58 }
  0xaa   :  { %v64_v16 = vmul.f32 %v54_v14, %v54_v14  ;;  %v62_v17 = vmul.f32 0.03125, %v59_v15  ;;  %v72_v28 = vsub.f32 %v48_v0, %v54_v14 }
  0xab   :  { %v53_v18 = vpop.xlane.xlu0 %52 }
  0xac   :  { %v66_v19 = vsub.f32 %v62_v17, %v64_v16  ;;  %v55_v20 = vmul.f32 0.03125, %v53_v18 }
  0xad   :  { %v61_v21 = vpop.xlane.xlu1 %60 }
  0xae   :  { %v68_v22 = vadd.f32 1e-05, %v66_v19  ;;  %v65_v23 = vmul.f32 %v55_v20, %v55_v20  ;;  %v63_v24 = vmul.f32 0.03125, %v61_v21  ;;  %v73_v29 = vsub.f32 %v49_v1, %v55_v20 }
  0xb0   :  { %v67_v25 = vsub.f32 %v63_v24, %v65_v23  ;;  %292 = vrsqrt.f32 %v68_v22 }
  0xb2   :  { %v69_v26 = vadd.f32 1e-05, %v67_v25 }
  0xb4   :  { %294 = vrsqrt.f32 %v69_v26 }
  0xbd   :  { %v293_v27 = vpop.eup %292 }
  0xbe   :  { %v74_v31 = vmul.f32 %v293_v27, %v72_v28 }
  0xc1   :  { %v295_v30 = vpop.eup %294 }
  0xc2   :  { %v75_v32 = vmul.f32 %v295_v30, %v73_v29 }
  0xc4   :  { %v243_v33 = vpack.c.bf16 %v75_v32, %v74_v31 }
  0xc6   :  { %244 = vst [vmem:[#allocation2] sm:$0xff] %v243_v33  }
  0xcd   :  { %v291_v34 = vld [vmem:[#allocation2] sm:$0xff]  }
  0xce   :  { %271 = vmatmul.mubr.bf16.vlgmr.msra.gmra.mxu0 %v291_v34 }
 0x18e   :  { %v199_v36 = vpop.f32.mrf.mxu0 }
 0x18f   :  { %v200_v37 = vadd.f32 %v228_v35, %v199_v36 }
 0x190   :  { %v272_v38 = vpop.f32.mrf.mxu0 }
 0x191   :  { %206 = vst [vmem:[#allocation8] sm:$0xff] %v200_v37 }
 0x192   :  { %v202_v39 = vpop.f32.mrf.mxu0 }
 0x193   :  { %v203_v40 = vadd.f32 %v228_v35, %v202_v39 }
 0x194   :  { %v273_v41 = vpop.f32.mrf.mxu0 }
 0x195   :  { %207 = vst [vmem:[#allocation8 + $0x8] sm:$0xff] %v203_v40 }
 0x196   :  { %347 = shalt.err (!%p344_p0)
}
 0x197   :  { %219 = dma.vmem_to_hbm [thread:$0]  %s214_s27, 256, %s412_s3, [#allocation5], %s363_s15, %s363_s15, %s364_s16  }
 0x198   :  { %360 = dma.done.wait [#allocation5], 256  }
 0x199   :  { %361 = vsyncadd [#allocation5], 4294967040 }
 0x19a   :  { %223 = vsyncpa [#allocation4], 1 }
 0x19b   :  { %224 = vsyncpa [#allocation7], 1 }
 0x19c   :  { %225 = vsyncpa [#allocation5], 1 }

</bundles_post_ra>
